<compile_context>
chip_gen: v6e
topology: v6e:2x2x1
jax: 0.10.0
libtpu: 0.0.40
codegen_flags: <defaults>
</compile_context>

<pallas_src>
import functools

import jax
import jax.numpy as jnp
from jax.experimental import pallas as pl
from jax.experimental.pallas import tpu as pltpu

LANE = 128
SUBLANE = 8


def _round_up(n, m):
    return ((n + m - 1) // m) * m


def mlp_kernel(x_ref, w_ref, b_ref, o_ref, *, d_in, d_out):
    # x_ref:  (tile_b, d_in)     compact activations (d_in == 16)
    # w_ref:  (3, 128, 128)      lane/sublane zero-padded weights (in, out)
    # b_ref:  (3, 128)           zero-padded biases
    # o_ref:  (tile_b, d_out)    compact output (d_out == 4)
    # Dropout(p=0.1) is identity in eval/inference mode, so it is omitted.
    x = x_ref[...]
    w1 = w_ref[0][:d_in, :]                      # (d_in, 128), padded rows dropped
    h = jnp.dot(x, w1, preferred_element_type=jnp.float32)
    h = jnp.maximum(h + b_ref[0:1, :], 0.0)
    h = jnp.dot(h, w_ref[1], preferred_element_type=jnp.float32)
    h = jnp.maximum(h + b_ref[1:2, :], 0.0)
    out = jnp.dot(h, w_ref[2], preferred_element_type=jnp.float32) + b_ref[2:3, :]
    o_ref[...] = out[:, :d_out].astype(o_ref.dtype)


def pack_params(params):
    """Zero-pad every weight/bias to 128-wide lanes and stack into a single
    (3, 128, 128) weight tensor and (3, 128) bias tensor.  Done once at init,
    NOT inside the kernel.  Zero padding keeps the math exact: padded hidden
    lanes get zero weight columns and zero bias, stay zero through ReLU, and
    the padded input rows of w1 are sliced off inside the kernel."""
    ws = [params["w1"], params["w2"], params["w3"]]
    bs = [params["b1"], params["b2"], params["b3"]]
    pad = _round_up(max(max(w.shape) for w in ws), LANE)
    w_stack = jnp.stack(
        [jnp.pad(w, ((0, pad - w.shape[0]), (0, pad - w.shape[1]))) for w in ws]
    )
    b_stack = jnp.stack(
        [jnp.pad(b.reshape(-1), (0, pad - b.shape[-1])) for b in bs]
    )
    meta = {"d_in": ws[0].shape[0], "d_out": ws[-1].shape[1], "pad": pad}
    return w_stack, b_stack, meta


def _choose_batch_tile(B, batch_tile, single_block_max):
    """Static (Python-level) tile selection.

    - Small batch: one full-height grid step (no pipeline churn).
    - Large batch: at least 2 tiles (both v7x TensorCores get work), capped at
      `batch_tile`, and shrunk while batch-padding waste exceeds ~12.5%.
    """
    if B <= single_block_max:
        return _round_up(B, SUBLANE)
    tile = min(batch_tile, _round_up(pl.cdiv(B, 2), SUBLANE))
    tile = _round_up(tile, SUBLANE)
    while tile > 256 and (_round_up(B, tile) - B) * 8 > B:
        tile = _round_up(max(tile // 2, SUBLANE), SUBLANE)
    return tile


@functools.partial(
    jax.jit, static_argnames=("d_in", "d_out", "batch_tile", "single_block_max")
)
def weather_prediction_forward(
    x, w_stack, b_stack, *, d_in, d_out, batch_tile=2048, single_block_max=1024
):
    """Fused MLP forward in one Pallas kernel.

    x:        (B, d_in)  float32, compact (NOT lane-padded)
    w_stack:  (3, P, P)  lane-padded weights (in_dim, out_dim layout), P = 128
    b_stack:  (3, P)     lane-padded biases
    returns:  (B, d_out) float32, compact
    """
    B, xdim = x.shape
    assert xdim == d_in
    n_layers, pad, _ = w_stack.shape

    # Batch tiling only; feature dims stay compact (16 in / 4 out) so every
    # HBM byte moved is useful data.  On v7x, consider batch_tile=4096.
    tile_b = _choose_batch_tile(B, batch_tile, single_block_max)
    b_pad = _round_up(B, tile_b)
    x_p = jnp.pad(x, ((0, b_pad - B), (0, 0))) if b_pad != B else x

    grid = (b_pad // tile_b,)
    # Megacore sharding only pays off with >=2 real batch tiles.
    semantics = ("parallel",) if grid[0] > 1 else ("arbitrary",)

    kernel = functools.partial(mlp_kernel, d_in=d_in, d_out=d_out)

    out_p = pl.pallas_call(
        kernel,
        out_shape=jax.ShapeDtypeStruct((b_pad, d_out), x.dtype),
        grid=grid,
        in_specs=[
            # activations: tiled over batch, compact 16-wide last dim
            # (legal: last block dim == full array dim)
            pl.BlockSpec((tile_b, d_in), lambda i: (i, 0)),
            # stacked weights / biases: full block, grid-invariant index_map
            # (fetched once; not re-DMA'd across grid steps)
            pl.BlockSpec((n_layers, pad, pad), lambda i: (0, 0, 0)),
            pl.BlockSpec((n_layers, pad), lambda i: (0, 0)),
        ],
        # compact 4-wide output store (masked vst, but ~16 B/row of HBM write)
        out_specs=pl.BlockSpec((tile_b, d_out), lambda i: (i, 0)),
        compiler_params=pltpu.CompilerParams(dimension_semantics=semantics),
    )(x_p, w_stack, b_stack)

    return out_p[:B] if b_pad != B else out_p


def init_params(key, input_dim, hidden_dims, output_dim):
    """Deterministic init mimicking nn.Linear (uniform(-1/sqrt(fan_in), 1/sqrt(fan_in))).
    Weights stored as (in_dim, out_dim) == PyTorch weight.T."""
    dims = [input_dim, *hidden_dims, output_dim]
    params = {}
    for li, (d_in, d_out) in enumerate(zip(dims[:-1], dims[1:]), start=1):
        key, kw, kb = jax.random.split(key, 3)
        bound = 1.0 / jnp.sqrt(jnp.float32(d_in))
        params[f"w{li}"] = jax.random.uniform(
            kw, (d_in, d_out), jnp.float32, -bound, bound
        )
        params[f"b{li}"] = jax.random.uniform(
            kb, (1, d_out), jnp.float32, -bound, bound
        )
    return params


def reference_forward(x, params):
    h = jnp.maximum(x @ params["w1"] + params["b1"], 0.0)
    h = jnp.maximum(h @ params["w2"] + params["b2"], 0.0)
    return h @ params["w3"] + params["b3"]


if __name__ == "__main__":
    key = jax.random.PRNGKey(0)

    # Module config: input_dim=16 weather features, hidden_dims=(32, 64),
    # output_dim=4 predicted load channels, batch=16.
    input_dim, hidden_dims, output_dim = 16, (32, 64), 4
    batch = 16

    kx, kp = jax.random.split(key)
    x = jax.random.normal(kx, (batch, input_dim), jnp.float32)
    params = init_params(kp, input_dim, hidden_dims, output_dim)
    w_stack, b_stack, meta = pack_params(params)

    # TODO(synk): training-mode Dropout(0.1) is not implemented (inference only).
    out = weather_prediction_forward(
        x, w_stack, b_stack, d_in=meta["d_in"], d_out=meta["d_out"]
    )
    out = jax.block_until_ready(out)

    ref = reference_forward(x, params)
    assert out.shape == (batch, output_dim)
    assert jnp.allclose(out, ref, atol=1e-5, rtol=1e-5)

    # Also exercise the large-batch path: >=2 grid steps ('parallel'),
    # non-tile-divisible batch (padded rows sliced off), compact 4-lane
    # masked output stores — the paths flagged in the correctness review.
    big_batch = 2600
    x_big = jax.random.normal(kx, (big_batch, input_dim), jnp.float32)
    out_big = jax.block_until_ready(
        weather_prediction_forward(
            x_big, w_stack, b_stack, d_in=meta["d_in"], d_out=meta["d_out"]
        )
    )
    ref_big = reference_forward(x_big, params)
    assert out_big.shape == (big_batch, output_dim)
    assert jnp.allclose(out_big, ref_big, atol=1e-4, rtol=1e-4)

    print("KERNEL_OK")
</pallas_src>

<mosaic_0001>
module attributes {stable_mosaic.version = 11 : i64} {
  func.func @mlp_kernel(%arg0: i32, %arg1: memref<16x16xf32, #tpu.memory_space<vmem>>, %arg2: memref<3x128x128xf32, #tpu.memory_space<vmem>>, %arg3: memref<3x128xf32, #tpu.memory_space<vmem>>, %arg4: memref<16x4xf32, #tpu.memory_space<vmem>>) attributes {dimension_semantics = [#tpu.dimension_semantics<arbitrary>], iteration_bounds = array<i64: 1>, scalar_prefetch = 0 : i64, scratch_operands = 0 : i64, tpu.core_type = #tpu.core_type<tc>, window_params = [{transform_indices = @transform_0, window_bounds = array<i64: 16, 16>}, {pipeline_mode = #tpu.pipeline_mode<synchronous>, transform_indices = @transform_1, window_bounds = array<i64: 3, 128, 128>}, {pipeline_mode = #tpu.pipeline_mode<synchronous>, transform_indices = @transform_2, window_bounds = array<i64: 3, 128>}, {transform_indices = @transform_3, window_bounds = array<i64: 16, 4>}]} {
    %c0 = arith.constant 0 : index
    %c0_0 = arith.constant 0 : index
    %0 = vector.load %arg1[%c0, %c0_0] : memref<16x16xf32, #tpu.memory_space<vmem>>, vector<16x16xf32>
    %c0_1 = arith.constant 0 : index
    %c0_2 = arith.constant 0 : index
    %c0_3 = arith.constant 0 : index
    %1 = vector.load %arg2[%c0_1, %c0_2, %c0_3] : memref<3x128x128xf32, #tpu.memory_space<vmem>>, vector<1x128x128xf32>
    %2 = vector.shape_cast %1 : vector<1x128x128xf32> to vector<128x128xf32>
    %3 = vector.extract_strided_slice %2 {offsets = [0, 0], sizes = [16, 128], strides = [1, 1]} : vector<128x128xf32> to vector<16x128xf32>
    %cst = arith.constant dense<0.000000e+00> : vector<16x128xf32>
    %4 = tpu.matmul %0, %3, %cst {dimension_numbers = #tpu.dot_dimension_numbers<[1], [0], [0], [1], [0, 0, 1, 1], [], []>} : vector<16x16xf32>, vector<16x128xf32>, vector<16x128xf32> -> vector<16x128xf32>
    %c0_4 = arith.constant 0 : index
    %c0_5 = arith.constant 0 : index
    %5 = vector.load %arg3[%c0_4, %c0_5] : memref<3x128xf32, #tpu.memory_space<vmem>>, vector<1x128xf32>
    %6 = vector.broadcast %5 : vector<1x128xf32> to vector<16x128xf32>
    %7 = arith.addf %4, %6 : vector<16x128xf32>
    %cst_6 = arith.constant 0.000000e+00 : f32
    %8 = vector.broadcast %cst_6 : f32 to vector<16x128xf32>
    %9 = arith.maximumf %7, %8 : vector<16x128xf32>
    %c1 = arith.constant 1 : index
    %c0_7 = arith.constant 0 : index
    %c0_8 = arith.constant 0 : index
    %10 = vector.load %arg2[%c1, %c0_7, %c0_8] : memref<3x128x128xf32, #tpu.memory_space<vmem>>, vector<1x128x128xf32>
    %11 = vector.shape_cast %10 : vector<1x128x128xf32> to vector<128x128xf32>
    %cst_9 = arith.constant dense<0.000000e+00> : vector<16x128xf32>
    %12 = tpu.matmul %9, %11, %cst_9 {dimension_numbers = #tpu.dot_dimension_numbers<[1], [0], [0], [1], [0, 0, 1, 1], [], []>} : vector<16x128xf32>, vector<128x128xf32>, vector<16x128xf32> -> vector<16x128xf32>
    %c1_10 = arith.constant 1 : index
    %c0_11 = arith.constant 0 : index
    %13 = vector.load %arg3[%c1_10, %c0_11] : memref<3x128xf32, #tpu.memory_space<vmem>>, vector<1x128xf32>
    %14 = vector.broadcast %13 : vector<1x128xf32> to vector<16x128xf32>
    %15 = arith.addf %12, %14 : vector<16x128xf32>
    %cst_12 = arith.constant 0.000000e+00 : f32
    %16 = vector.broadcast %cst_12 : f32 to vector<16x128xf32>
    %17 = arith.maximumf %15, %16 : vector<16x128xf32>
    %c2 = arith.constant 2 : index
    %c0_13 = arith.constant 0 : index
    %c0_14 = arith.constant 0 : index
    %18 = vector.load %arg2[%c2, %c0_13, %c0_14] : memref<3x128x128xf32, #tpu.memory_space<vmem>>, vector<1x128x128xf32>
    %19 = vector.shape_cast %18 : vector<1x128x128xf32> to vector<128x128xf32>
    %cst_15 = arith.constant dense<0.000000e+00> : vector<16x128xf32>
    %20 = tpu.matmul %17, %19, %cst_15 {dimension_numbers = #tpu.dot_dimension_numbers<[1], [0], [0], [1], [0, 0, 1, 1], [], []>} : vector<16x128xf32>, vector<128x128xf32>, vector<16x128xf32> -> vector<16x128xf32>
    %c2_16 = arith.constant 2 : index
    %c0_17 = arith.constant 0 : index
    %21 = vector.load %arg3[%c2_16, %c0_17] : memref<3x128xf32, #tpu.memory_space<vmem>>, vector<1x128xf32>
    %22 = vector.broadcast %21 : vector<1x128xf32> to vector<16x128xf32>
    %23 = arith.addf %20, %22 : vector<16x128xf32>
    %24 = vector.extract_strided_slice %23 {offsets = [0, 0], sizes = [16, 4], strides = [1, 1]} : vector<16x128xf32> to vector<16x4xf32>
    %c0_18 = arith.constant 0 : index
    %c0_19 = arith.constant 0 : index
    %25 = vector.load %arg4[%c0_18, %c0_19] : memref<16x4xf32, #tpu.memory_space<vmem>>, vector<16x4xf32>
    tpu.vector_store %arg4[%c0_18, %c0_19], %24 {strides = array<i32>} : memref<16x4xf32, #tpu.memory_space<vmem>>, vector<16x4xf32>,
    return
  }
  func.func @transform_0(%arg0: i32) -> (i32, i32) {
    %c0_i32 = arith.constant 0 : i32
    %c0_i32_0 = arith.constant 0 : i32
    return %arg0, %c0_i32 : i32, i32
  }
  func.func @transform_1(%arg0: i32) -> (i32, i32, i32) {
    %c0_i32 = arith.constant 0 : i32
    %c0_i32_0 = arith.constant 0 : i32
    %c0_i32_1 = arith.constant 0 : i32
    %c0_i32_2 = arith.constant 0 : i32
    return %c0_i32, %c0_i32_0, %c0_i32_1 : i32, i32, i32
  }
  func.func @transform_2(%arg0: i32) -> (i32, i32) {
    %c0_i32 = arith.constant 0 : i32
    %c0_i32_0 = arith.constant 0 : i32
    %c0_i32_1 = arith.constant 0 : i32
    return %c0_i32, %c0_i32_0 : i32, i32
  }
  func.func @transform_3(%arg0: i32) -> (i32, i32) {
    %c0_i32 = arith.constant 0 : i32
    %c0_i32_0 = arith.constant 0 : i32
    return %arg0, %c0_i32 : i32, i32
  }
}

</mosaic_0001>

<bundles_post_ra>
// kernel: weather_prediction_forward.1
= control target key start
LH: loop header
LB: loop body
LE: loop exit
PB: predicated region body
PF: predicated region fallthrough
CT: control target
= control target key end

     0   :  { %8 = vsyncpa [#allocation3], 0  ;;  %s584_s0 = inlined_call_operand.hbm [shape: f32[16,16], index: 0, kind: input, shape index: {}]   ;;  %s585_s1 = inlined_call_operand.hbm [shape: f32[3,128,128], index: 1, kind: input, shape index: {}]   ;;  %s586_s2 = inlined_call_operand.hbm [shape: f32[3,128], index: 2, kind: input, shape index: {}]   ;;  %s587_s3 = inlined_call_operand.vmem [shape: f32[16,4], index: 3, kind: output, shape index: {}]  }
   0x1   :  { %9 = vsyncpa [#allocation5], 0  ;;  %s542_s12 = smov [#allocation4]   ;;  %s543_s14 = smov [#allocation2]  }
   0x2   :  { %s27_s13 = sshll.u32 %s542_s12, 4  ;;  %s15_s15 = sshll.u32 %s543_s14, 4  ;;  %s28_s13 = int_to_ptr.vmem [resolvable:$true] %s27_s13  ;;  %s16_s15 = int_to_ptr.vmem [resolvable:$true] %s15_s15 }
   0x3   :  { %s486_s16 = scalar_lea.vmem %s28_s13, 6144  ;;  %p491_p1 = scmp.lt.s32.totalorder %s28_s13, %s28_s13 }
   0x4   :  { %p487_p0 = scmp.ne.s32.totalorder %s28_s13, %s486_s16  ;;  %p492_p2 = scmp.lt.s32.totalorder %s486_s16, %s486_s16 }
   0x6   :  { %p493_p3 = por %p492_p2, %p491_p1 }
   0x8   :  { %p494_p4 = pnand %p493_p3, %p487_p0 }
   0xa   :  { %497 = shalt.err (!%p494_p4)
}
   0xb   :  { %s544_s17 = smov 128   ;;  %s545_s18 = smov 8  }
   0xc   :  { %33 = dma.hbm_to_vmem [thread:$0]  %s585_s1, 6144, %s28_s13, [#allocation5], %s544_s17, %s544_s17, %s545_s18  }
   0xd   :  { %s506_s21 = scalar_lea.vmem %s16_s15, 256  ;;  %p511_p6 = scmp.lt.s32.totalorder %s16_s15, %s16_s15 }
   0xe   :  { %p507_p5 = scmp.ne.s32.totalorder %s16_s15, %s506_s21  ;;  %p512_p7 = scmp.lt.s32.totalorder %s506_s21, %s506_s21 }
  0x10   :  { %p513_p8 = por %p512_p7, %p511_p6 }
  0x12   :  { %p514_p9 = pnand %p513_p8, %p507_p5 }
  0x14   :  { %517 = shalt.err (!%p514_p9)
}
  0x15   :  { %21 = dma.hbm_to_vmem [thread:$0]  %s584_s0, 256, %s16_s15, [#allocation3], %s544_s17, %s544_s17, %s545_s18  }
  0x16   :  { %s546_s24 = smov [#allocation6]  }
  0x17   :  { %s40_s25 = sshll.u32 %s546_s24, 4  ;;  %s41_s25 = int_to_ptr.vmem [resolvable:$true] %s40_s25 }
  0x18   :  { %s526_s26 = scalar_lea.vmem %s41_s25, 64  ;;  %p531_p11 = scmp.lt.s32.totalorder %s41_s25, %s41_s25 }
  0x19   :  { %p527_p10 = scmp.ne.s32.totalorder %s41_s25, %s526_s26  ;;  %p532_p12 = scmp.lt.s32.totalorder %s526_s26, %s526_s26 }
  0x1b   :  { %p533_p13 = por %p532_p12, %p531_p11 }
  0x1d   :  { %p534_p0 = pnand %p533_p13, %p527_p10 }
  0x1f   :  { %537 = shalt.err (!%p534_p0)
}
  0x20   :  { %43 = dma.hbm_to_vmem [thread:$0]  %s586_s2, 64, %s41_s25, [#allocation5]  }
  0x21   :  { %538 = dma.done.wait [#allocation3], 256  }
  0x22   :  { %539 = vsyncadd [#allocation3], 4294967040 }
  0x23   :  { %540 = dma.done.wait [#allocation5], 6208  }
  0x24   :  { %541 = vsyncadd [#allocation5], 4294961088  ;;  %vm62_vm0 = vcmask 130048   ;;  %v56_v0 = vld [vmem:[#allocation4 + $0x8] sm:$0xff]  ;;  %v55_v1 = vld [vmem:[#allocation4] sm:$0xff]  ;;  %vm342_vm1 = vcmask 31744  }
  0x25   :  { %v53_v2 = vld [vmem:[#allocation2] sm:$0xff]  ;;  %396 = vmatprep.subr.mxu0 %v56_v0  ;;  %v162_v3 = vld [vmem:[#allocation4 + $0xf8] sm:$0xff]  ;;  %v160_v6 = vld [vmem:[#allocation4 + $0xe8] sm:$0xff] }
  0x26   :  { %400 = vmatprep.mubr.msk.f32.mxu0 %vm62_vm0, %v53_v2  ;;  %v161_v4 = vld [vmem:[#allocation4 + $0xf0] sm:$0xff]  ;;  %397 = vmatpush3.msra.mxu0 %v56_v0  ;;  %v54_v5 = vld [vmem:[#allocation2 + $0x8] sm:$0xff]  ;;  %v159_v7 = vld [vmem:[#allocation4 + $0xe0] sm:$0xff] }
  0x27   :  { %403 = vmatprep.subr.mxu1 %v162_v3  ;;  %398 = vmatprep.subr.mxu0 %v55_v1  ;;  %v158_v8 = vld [vmem:[#allocation4 + $0xd8] sm:$0xff]  ;;  %v157_v9 = vld [vmem:[#allocation4 + $0xd0] sm:$0xff]  ;;  %v156_v10 = vld [vmem:[#allocation4 + $0xc8] sm:$0xff] }
  0x28   :  { %404 = vmatpush3.msra.mxu1 %v162_v3  ;;  %399 = vmatpush3.msra.mxu0 %v55_v1  ;;  %v155_v11 = vld [vmem:[#allocation4 + $0xc0] sm:$0xff]  ;;  %v154_v12 = vld [vmem:[#allocation4 + $0xb8] sm:$0xff]  ;;  %v153_v13 = vld [vmem:[#allocation4 + $0xb0] sm:$0xff] }
  0x29   :  { %405 = vmatprep.subr.mxu1 %v161_v4  ;;  %401 = vmatmul.mubr.msk.f32.vlgmr.msra.gmra.mxu0 %vm62_vm0, %v54_v5  ;;  %v152_v14 = vld [vmem:[#allocation4 + $0xa8] sm:$0xff]  ;;  %v151_v15 = vld [vmem:[#allocation4 + $0xa0] sm:$0xff]  ;;  %v150_v16 = vld [vmem:[#allocation4 + $0x98] sm:$0xff] }
  0x2a   :  { %406 = vmatpush3.msra.mxu1 %v161_v4  ;;  %v149_v17 = vld [vmem:[#allocation4 + $0x90] sm:$0xff]  ;;  %v148_v18 = vld [vmem:[#allocation4 + $0x88] sm:$0xff]  ;;  %v147_v19 = vld [vmem:[#allocation4 + $0x80] sm:$0xff] }
  0x2b   :  { %407 = vmatprep.subr.mxu1 %v160_v6  ;;  %v261_v20 = vld [vmem:[#allocation4 + $0x178] sm:$0xff]  ;;  %v260_v21 = vld [vmem:[#allocation4 + $0x170] sm:$0xff]  ;;  %v259_v22 = vld [vmem:[#allocation4 + $0x168] sm:$0xff] }
  0x2c   :  { %408 = vmatpush3.msra.mxu1 %v160_v6  ;;  %438 = vmatprep.subr.mxu0 %v261_v20  ;;  %v258_v23 = vld [vmem:[#allocation4 + $0x160] sm:$0xff]  ;;  %v257_v24 = vld [vmem:[#allocation4 + $0x158] sm:$0xff]  ;;  %v256_v25 = vld [vmem:[#allocation4 + $0x150] sm:$0xff] }
  0x2d   :  { %409 = vmatprep.subr.mxu1 %v159_v7  ;;  %439 = vmatpush3.msra.mxu0 %v261_v20  ;;  %v255_v26 = vld [vmem:[#allocation4 + $0x148] sm:$0xff]  ;;  %v254_v27 = vld [vmem:[#allocation4 + $0x140] sm:$0xff]  ;;  %v253_v28 = vld [vmem:[#allocation4 + $0x138] sm:$0xff] }
  0x2e   :  { %410 = vmatpush3.msra.mxu1 %v159_v7  ;;  %440 = vmatprep.subr.mxu0 %v260_v21  ;;  %v252_v29 = vld [vmem:[#allocation4 + $0x130] sm:$0xff]  ;;  %v251_v30 = vld [vmem:[#allocation4 + $0x128] sm:$0xff]  ;;  %v250_v31 = vld [vmem:[#allocation4 + $0x120] sm:$0xff] }
  0x2f   :  { %411 = vmatprep.subr.mxu1 %v158_v8  ;;  %441 = vmatpush3.msra.mxu0 %v260_v21  ;;  %v351_v32 = vld [vmem:[#allocation6] ss:$0 sm:$0xff]  ;;  %v249_v39 = vld [vmem:[#allocation4 + $0x118] sm:$0xff]  ;;  %v248_v40 = vld [vmem:[#allocation4 + $0x110] sm:$0xff] }
  0x30   :  { %412 = vmatpush3.msra.mxu1 %v158_v8  ;;  %442 = vmatprep.subr.mxu0 %v259_v22  ;;  %v247_v41 = vld [vmem:[#allocation4 + $0x108] sm:$0xff]  ;;  %v246_v42 = vld [vmem:[#allocation4 + $0x100] sm:$0xff] }
  0x31   :  { %413 = vmatprep.subr.mxu1 %v157_v9  ;;  %443 = vmatpush3.msra.mxu0 %v259_v22  ;;  %v354_v43 = vld [vmem:[#allocation6 + $0x1] ss:$0 sm:$0xff]  ;;  %v355_v50 = vld [vmem:[#allocation6 + $0x2] ss:$0 sm:$0xff] }
  0x32   :  { %414 = vmatpush3.msra.mxu1 %v157_v9  ;;  %444 = vmatprep.subr.mxu0 %v258_v23 }
  0x33   :  { %415 = vmatprep.subr.mxu1 %v156_v10  ;;  %445 = vmatpush3.msra.mxu0 %v258_v23 }
  0x34   :  { %416 = vmatpush3.msra.mxu1 %v156_v10  ;;  %446 = vmatprep.subr.mxu0 %v257_v24 }
  0x35   :  { %417 = vmatprep.subr.mxu1 %v155_v11  ;;  %447 = vmatpush3.msra.mxu0 %v257_v24 }
  0x36   :  { %418 = vmatpush3.msra.mxu1 %v155_v11  ;;  %448 = vmatprep.subr.mxu0 %v256_v25 }
  0x37   :  { %419 = vmatprep.subr.mxu1 %v154_v12  ;;  %449 = vmatpush3.msra.mxu0 %v256_v25 }
  0x38   :  { %420 = vmatpush3.msra.mxu1 %v154_v12  ;;  %450 = vmatprep.subr.mxu0 %v255_v26 }
  0x39   :  { %421 = vmatprep.subr.mxu1 %v153_v13  ;;  %451 = vmatpush3.msra.mxu0 %v255_v26 }
  0x3a   :  { %422 = vmatpush3.msra.mxu1 %v153_v13  ;;  %452 = vmatprep.subr.mxu0 %v254_v27 }
  0x3b   :  { %423 = vmatprep.subr.mxu1 %v152_v14  ;;  %453 = vmatpush3.msra.mxu0 %v254_v27 }
  0x3c   :  { %424 = vmatpush3.msra.mxu1 %v152_v14  ;;  %454 = vmatprep.subr.mxu0 %v253_v28 }
  0x3d   :  { %425 = vmatprep.subr.mxu1 %v151_v15  ;;  %455 = vmatpush3.msra.mxu0 %v253_v28 }
  0x3e   :  { %426 = vmatpush3.msra.mxu1 %v151_v15  ;;  %456 = vmatprep.subr.mxu0 %v252_v29 }
  0x3f   :  { %427 = vmatprep.subr.mxu1 %v150_v16  ;;  %457 = vmatpush3.msra.mxu0 %v252_v29 }
  0x40   :  { %428 = vmatpush3.msra.mxu1 %v150_v16  ;;  %458 = vmatprep.subr.mxu0 %v251_v30 }
  0x41   :  { %429 = vmatprep.subr.mxu1 %v149_v17  ;;  %459 = vmatpush3.msra.mxu0 %v251_v30 }
  0x42   :  { %430 = vmatpush3.msra.mxu1 %v149_v17  ;;  %460 = vmatprep.subr.mxu0 %v250_v31 }
  0x43   :  { %431 = vmatprep.subr.mxu1 %v148_v18  ;;  %461 = vmatpush3.msra.mxu0 %v250_v31 }
  0x44   :  { %432 = vmatpush3.msra.mxu1 %v148_v18  ;;  %462 = vmatprep.subr.mxu0 %v249_v39 }
  0x45   :  { %433 = vmatprep.subr.mxu1 %v147_v19  ;;  %463 = vmatpush3.msra.mxu0 %v249_v39 }
  0x46   :  { %434 = vmatpush3.msra.mxu1 %v147_v19  ;;  %464 = vmatprep.subr.mxu0 %v248_v40 }
  0x47   :  { %465 = vmatpush3.msra.mxu0 %v248_v40 }
  0x48   :  { %466 = vmatprep.subr.mxu0 %v247_v41 }
  0x49   :  { %467 = vmatpush3.msra.mxu0 %v247_v41 }
  0x4a   :  { %468 = vmatprep.subr.mxu0 %v246_v42 }
  0x4b   :  { %469 = vmatpush3.msra.mxu0 %v246_v42 }
  0xe9   :  { %v402_v33 = vpop.f32.mrf.mxu0 }
  0xea   :  { %v141_v34 = vadd.f32 %v402_v33, %v351_v32 }
  0xeb   :  { %v135_v35 = vpop.f32.mrf.mxu0 }
  0xec   :  { %v136_v36 = vadd.f32 %v351_v32, %v135_v35  ;;  %v145_v38 = vmax.f32 %v141_v34, 0.0 }
  0xee   :  { %v144_v37 = vmax.f32 %v136_v36, 0.0 }
  0xf0   :  { %435 = vmatprep.mubr.f32.mxu1 %v144_v37 }
  0xf1   :  { %436 = vmatmul.mubr.f32.vlgmr.msra.gmra.mxu1 %v145_v38 }
 0x1b1   :  { %v437_v44 = vpop.f32.mrf.mxu1 }
 0x1b2   :  { %v240_v45 = vadd.f32 %v437_v44, %v354_v43 }
 0x1b3   :  { %v234_v46 = vpop.f32.mrf.mxu1 }
 0x1b4   :  { %v235_v47 = vadd.f32 %v354_v43, %v234_v46  ;;  %v244_v49 = vmax.f32 %v240_v45, 0.0 }
 0x1b6   :  { %v243_v48 = vmax.f32 %v235_v47, 0.0 }
 0x1b8   :  { %470 = vmatprep.mubr.f32.mxu0 %v243_v48 }
 0x1b9   :  { %471 = vmatmul.mubr.f32.vlgmr.msra.gmra.mxu0 %v244_v49 }
 0x279   :  { %v472_v51 = vpop.f32.mrf.mxu0 }
 0x27a   :  { %v339_v52 = vadd.f32 %v472_v51, %v355_v50 }
 0x27b   :  { %v333_v53 = vpop.f32.mrf.mxu0 }
 0x27c   :  { %344 = vst.msk [vmem:[%s587_s3 + $0x8] sm:$0xff] %vm342_vm1, %v339_v52  ;;  %v334_v54 = vadd.f32 %v355_v50, %v333_v53 }
 0x27e   :  { %343 = vst.msk [vmem:[%s587_s3] sm:$0xff] %vm342_vm1, %v334_v54 }
 0x27f   :  { %349 = vsyncpa [#allocation3], 1 }
 0x280   :  { %350 = vsyncpa [#allocation5], 1 }

</bundles_post_ra>
